<compile_context>
chip_gen: v5e
topology: v5e:2x2
jax: 0.10.0
libtpu: 0.0.40
codegen_flags: <defaults>
</compile_context>

<pallas_src>
import jax
import jax.numpy as jnp
from jax.experimental import pallas as pl
from jax.experimental.pallas import tpu as pltpu

SELU_ALPHA = 1.6732632423543772
SELU_SCALE = 1.0507009873554805
LANE = 128


def _selu(x):
    # SELU(x) = scale * (max(0, x) + min(0, alpha*(exp(x)-1))); computed in f32.
    # Clamp the exp argument so the unselected branch never produces inf.
    neg = SELU_ALPHA * (jnp.exp(jnp.minimum(x, 0.0)) - 1.0)
    return SELU_SCALE * jnp.where(x > 0, x, neg)


def _round_up(x, m):
    return (x + m - 1) // m * m


def atn_a_kernel(x_ref, w1_ref, b1_ref, w2_ref, b2_ref, w3_ref, b3_ref, o_ref):
    # x arrives f32 from HBM; cast to the weight dtype in-kernel (hidden under
    # the MXU) instead of paying an extra HBM round trip in a wrapper cast.
    x = x_ref[...].astype(w1_ref.dtype)

    # layer1: Linear + SELU (f32 accumulation on the MXU, SELU on VPU/EUP)
    h = jnp.dot(x, w1_ref[...], preferred_element_type=jnp.float32) + b1_ref[...]
    h = _selu(h)

    # layer2: Linear + SELU
    h = jnp.dot(h.astype(w2_ref.dtype), w2_ref[...],
                preferred_element_type=jnp.float32) + b2_ref[...]
    h = _selu(h)

    # layer3: Linear (the (x - weight_b) * weight_a affine is folded into w3/b3)
    h = jnp.dot(h.astype(w3_ref.dtype), w3_ref[...],
                preferred_element_type=jnp.float32) + b3_ref[...]

    # sigmoid via tanh keeps the divide off the VPU (tanh uses the EUP slot).
    o_ref[...] = (0.5 * (jnp.tanh(0.5 * h) + 1.0)).astype(o_ref.dtype)


def prepare_kernel_params(params, weights_dtype=jnp.bfloat16, lane=LANE):
    """Fold the post-affine into layer3, lane-pad, cast weights to compute dtype.

    Weights are stored transposed as (in, out).  Zero-padding rows/cols to
    multiples of 128 is exact: padded inputs are zero, padded hidden units get
    zero weight and zero bias (SELU(0) == 0), padded outputs are sliced off.
    """
    w1, b1, w2, b2, w3, b3, weight_a, weight_b = params
    # (h - weight_b) * weight_a  ==  h @ (weight_a * w3) + weight_a * (b3 - weight_b)
    w3f = w3 * weight_a
    b3f = (b3 - weight_b) * weight_a

    d, inner = w1.shape
    d_pad = _round_up(d, lane)
    inner_pad = _round_up(inner, lane)

    def pad2(a, rows, cols):
        return jnp.pad(a, ((0, rows - a.shape[0]), (0, cols - a.shape[1])))

    w1 = pad2(w1, d_pad, inner_pad)
    b1 = pad2(b1, 1, inner_pad)
    w2 = pad2(w2, inner_pad, inner_pad)
    b2 = pad2(b2, 1, inner_pad)
    w3f = pad2(w3f, inner_pad, d_pad)
    b3f = pad2(b3f, 1, d_pad)

    return (w1.astype(weights_dtype), b1.astype(jnp.float32),
            w2.astype(weights_dtype), b2.astype(jnp.float32),
            w3f.astype(weights_dtype), b3f.astype(jnp.float32))


def atn_a_forward(x, params, *, channel, width, tm=256,
                  weights_dtype=jnp.bfloat16, out_dtype=jnp.float32):
    """x: (B, C, W, W) float32 -> (B, C, W, W) out_dtype (default f32).

    Set out_dtype=jnp.bfloat16 to halve output writeback traffic if downstream
    tolerates bf16 sigmoid values.
    """
    b = x.shape[0]
    d = channel * width * width
    x_flat = x.reshape(b, d)

    w1, b1, w2, b2, w3, b3 = prepare_kernel_params(params, weights_dtype)
    d_pad = w1.shape[0]
    inner_pad = w1.shape[1]

    # Batch (M) tile: multiple of 16 (bf16 sublane tile), as large as requested,
    # but guarantee >= 2 grid steps for B >= 32 so ("parallel",) can shard the
    # batch across both v7x TensorCores.
    b16 = _round_up(b, 16)
    tm_eff = max(16, min(tm, b16))
    if b16 >= 32 and pl.cdiv(b16, tm_eff) < 2:
        tm_eff = _round_up(pl.cdiv(b16, 2), 16)
    b_pad = _round_up(b, tm_eff)

    # Pad batch and (if needed) feature dim; keep x in f32 (cast happens in-kernel).
    if b_pad != b or d_pad != d:
        x_flat = jnp.pad(x_flat, ((0, b_pad - b), (0, d_pad - d)))

    grid = (pl.cdiv(b_pad, tm_eff),)

    def const_spec(shape):
        # Whole-array block, same block every grid step -> VMEM-resident.
        # Buffered(1): single buffer (never re-DMA'd), halves weight VMEM.
        nd = len(shape)
        return pl.BlockSpec(shape, lambda i, _nd=nd: (0,) * _nd,
                            pipeline_mode=pl.Buffered(1))

    # Explicit scoped-VMEM budget: resident weights/biases (single-buffered) +
    # double-buffered x/out blocks + f32 activation working set + headroom,
    # clamped to the v7x per-TC physical VMEM (64 MiB).
    itemsize_w = jnp.dtype(weights_dtype).itemsize
    itemsize_o = jnp.dtype(out_dtype).itemsize
    resident = (w1.size + w2.size + w3.size) * itemsize_w \
        + (b1.size + b2.size + b3.size) * 4
    per_step_io = 2 * tm_eff * d_pad * 4 + 2 * tm_eff * d_pad * itemsize_o
    activations = 4 * tm_eff * inner_pad * 4
    vmem_limit = int(1.5 * (resident + per_step_io + activations)) + (4 << 20)
    vmem_limit = max(32 << 20, min(vmem_limit, 64 << 20))

    out_flat = pl.pallas_call(
        atn_a_kernel,
        out_shape=jax.ShapeDtypeStruct((b_pad, d_pad), out_dtype),
        grid=grid,
        in_specs=[
            pl.BlockSpec((tm_eff, d_pad), lambda i: (i, 0)),  # x: batch-tiled, f32
            const_spec((d_pad, inner_pad)),                   # w1 (in, out)
            const_spec((1, inner_pad)),                       # b1
            const_spec((inner_pad, inner_pad)),               # w2
            const_spec((1, inner_pad)),                       # b2
            const_spec((inner_pad, d_pad)),                   # w3 (affine folded)
            const_spec((1, d_pad)),                           # b3 (affine folded)
        ],
        out_specs=pl.BlockSpec((tm_eff, d_pad), lambda i: (i, 0)),
        compiler_params=pltpu.CompilerParams(
            dimension_semantics=("parallel",),
            vmem_limit_bytes=vmem_limit),
    )(x_flat, w1, b1, w2, b2, w3, b3)

    return out_flat[:b, :d].reshape(b, channel, width, width)


def init_params(key, *, channel, width, innerlayer):
    """Deterministic init mimicking nn.Linear shapes (weights stored transposed)."""
    d = channel * width * width
    ks = jax.random.split(key, 6)

    def lin(kw, kb, fan_in, fan_out):
        bound = 1.0 / jnp.sqrt(fan_in)
        # torch stores (out, in); we store (in, out) = transpose.
        w = jax.random.uniform(kw, (fan_in, fan_out), jnp.float32, -bound, bound)
        bias = jax.random.uniform(kb, (1, fan_out), jnp.float32, -bound, bound)
        return w, bias

    w1, b1 = lin(ks[0], ks[1], d, innerlayer)
    w2, b2 = lin(ks[2], ks[3], innerlayer, innerlayer)
    w3, b3 = lin(ks[4], ks[5], innerlayer, d)
    weight_a = jnp.array([1.5], jnp.float32)   # module buffers, passed (not hardcoded)
    weight_b = jnp.array([0.5], jnp.float32)
    return (w1, b1, w2, b2, w3, b3, weight_a, weight_b)


def reference_forward(x, params, *, channel, width):
    """Pure-f32 JAX reference matching the PyTorch forward exactly."""
    b = x.shape[0]
    w1, b1, w2, b2, w3, b3, weight_a, weight_b = params
    h = x.reshape(b, -1)
    h = _selu(h @ w1 + b1)
    h = _selu(h @ w2 + b2)
    h = h @ w3 + b3
    h = jax.nn.sigmoid((h - weight_b) * weight_a)
    return h.reshape(b, channel, width, width)


def reference_forward_quantized(x, params, *, channel, width,
                                weights_dtype=jnp.bfloat16):
    """Reference mirroring the kernel's bf16-weight / f32-accumulate / padded math."""
    b = x.shape[0]
    d = channel * width * width
    w1, b1, w2, b2, w3, b3 = prepare_kernel_params(params, weights_dtype)
    d_pad = w1.shape[0]
    h = x.reshape(b, -1)
    if d_pad != d:
        h = jnp.pad(h, ((0, 0), (0, d_pad - d)))
    h = h.astype(weights_dtype)
    h = _selu(jnp.dot(h, w1, preferred_element_type=jnp.float32) + b1)
    h = _selu(jnp.dot(h.astype(weights_dtype), w2,
                      preferred_element_type=jnp.float32) + b2)
    h = jnp.dot(h.astype(weights_dtype), w3,
                preferred_element_type=jnp.float32) + b3
    h = 0.5 * (jnp.tanh(0.5 * h) + 1.0)
    return h[:, :d].reshape(b, channel, width, width)


if __name__ == "__main__":
    # Small shapes consistent with the module's forward: (B, C, W, W).
    # batch=32 with tm=16 gives a 2-step "parallel" grid to exercise the tiling.
    batch, channel, width, innerlayer = 32, 1, 16, 128

    key = jax.random.PRNGKey(0)
    k_x, k_p = jax.random.split(key)
    x = jax.random.normal(k_x, (batch, channel, width, width), jnp.float32)
    params = init_params(k_p, channel=channel, width=width, innerlayer=innerlayer)

    out = atn_a_forward(x, params, channel=channel, width=width, tm=16)
    out = jax.block_until_ready(out)
    assert out.shape == (batch, channel, width, width)

    # Tight check vs a reference that mirrors the kernel's bf16/f32 math.
    ref_q = reference_forward_quantized(x, params, channel=channel, width=width)
    assert jnp.allclose(out, ref_q, atol=1e-3, rtol=1e-3), "mismatch vs quantized ref"

    # Loose check vs the exact f32 module semantics (bf16 quantization only).
    ref = reference_forward(x, params, channel=channel, width=width)
    assert jnp.allclose(out, ref, atol=5e-2, rtol=5e-2), "mismatch vs f32 reference"

    print("KERNEL_OK")
</pallas_src>

<mosaic_0001>
module attributes {stable_mosaic.version = 11 : i64} {
  func.func @atn_a_kernel(%arg0: i32, %arg1: memref<16x256xf32, #tpu.memory_space<vmem>>, %arg2: memref<256x128xbf16, #tpu.memory_space<vmem>>, %arg3: memref<1x128xf32, #tpu.memory_space<vmem>>, %arg4: memref<128x128xbf16, #tpu.memory_space<vmem>>, %arg5: memref<1x128xf32, #tpu.memory_space<vmem>>, %arg6: memref<128x256xbf16, #tpu.memory_space<vmem>>, %arg7: memref<1x256xf32, #tpu.memory_space<vmem>>, %arg8: memref<16x256xf32, #tpu.memory_space<vmem>>) attributes {dimension_semantics = [#tpu.dimension_semantics<parallel>], iteration_bounds = array<i64: 2>, scalar_prefetch = 0 : i64, scratch_operands = 0 : i64, tpu.core_type = #tpu.core_type<tc>, window_params = [{transform_indices = @transform_0, window_bounds = array<i64: 16, 256>}, {pipeline_mode = #tpu.pipeline_mode<synchronous>, transform_indices = @transform_1, window_bounds = array<i64: 256, 128>}, {pipeline_mode = #tpu.pipeline_mode<synchronous>, transform_indices = @transform_2, window_bounds = array<i64: 1, 128>}, {pipeline_mode = #tpu.pipeline_mode<synchronous>, transform_indices = @transform_3, window_bounds = array<i64: 128, 128>}, {pipeline_mode = #tpu.pipeline_mode<synchronous>, transform_indices = @transform_4, window_bounds = array<i64: 1, 128>}, {pipeline_mode = #tpu.pipeline_mode<synchronous>, transform_indices = @transform_5, window_bounds = array<i64: 128, 256>}, {pipeline_mode = #tpu.pipeline_mode<synchronous>, transform_indices = @transform_6, window_bounds = array<i64: 1, 256>}, {transform_indices = @transform_7, window_bounds = array<i64: 16, 256>}]} {
    %c0 = arith.constant 0 : index
    %c0_0 = arith.constant 0 : index
    %0 = vector.load %arg1[%c0, %c0_0] : memref<16x256xf32, #tpu.memory_space<vmem>>, vector<16x256xf32>
    %1 = arith.truncf %0 : vector<16x256xf32> to vector<16x256xbf16>
    %c0_1 = arith.constant 0 : index
    %c0_2 = arith.constant 0 : index
    %2 = vector.load %arg2[%c0_1, %c0_2] : memref<256x128xbf16, #tpu.memory_space<vmem>>, vector<256x128xbf16>
    %cst = arith.constant dense<0.000000e+00> : vector<16x128xf32>
    %3 = tpu.matmul %1, %2, %cst {dimension_numbers = #tpu.dot_dimension_numbers<[1], [0], [0], [1], [0, 0, 1, 1], [], []>} : vector<16x256xbf16>, vector<256x128xbf16>, vector<16x128xf32> -> vector<16x128xf32>
    %c0_3 = arith.constant 0 : index
    %c0_4 = arith.constant 0 : index
    %4 = vector.load %arg3[%c0_3, %c0_4] : memref<1x128xf32, #tpu.memory_space<vmem>>, vector<1x128xf32>
    %5 = vector.broadcast %4 : vector<1x128xf32> to vector<16x128xf32>
    %6 = arith.addf %3, %5 : vector<16x128xf32>
    %cst_5 = arith.constant 0.000000e+00 : f32
    %7 = vector.broadcast %cst_5 : f32 to vector<16x128xf32>
    %8 = arith.minimumf %6, %7 : vector<16x128xf32>
    %9 = math.exp %8 : vector<16x128xf32>
    %cst_6 = arith.constant 1.000000e+00 : f32
    %10 = vector.broadcast %cst_6 : f32 to vector<16x128xf32>
    %11 = arith.subf %9, %10 : vector<16x128xf32>
    %cst_7 = arith.constant 1.67326319 : f32
    %12 = vector.broadcast %cst_7 : f32 to vector<16x128xf32>
    %13 = arith.mulf %12, %11 : vector<16x128xf32>
    %cst_8 = arith.constant 0.000000e+00 : f32
    %14 = vector.broadcast %cst_8 : f32 to vector<16x128xf32>
    %15 = arith.cmpf ogt, %6, %14 : vector<16x128xf32>
    %16 = arith.select %15, %6, %13 : vector<16x128xi1>, vector<16x128xf32>
    %cst_9 = arith.constant 1.05070102 : f32
    %17 = vector.broadcast %cst_9 : f32 to vector<16x128xf32>
    %18 = arith.mulf %17, %16 : vector<16x128xf32>
    %19 = arith.truncf %18 : vector<16x128xf32> to vector<16x128xbf16>
    %c0_10 = arith.constant 0 : index
    %c0_11 = arith.constant 0 : index
    %20 = vector.load %arg4[%c0_10, %c0_11] : memref<128x128xbf16, #tpu.memory_space<vmem>>, vector<128x128xbf16>
    %cst_12 = arith.constant dense<0.000000e+00> : vector<16x128xf32>
    %21 = tpu.matmul %19, %20, %cst_12 {dimension_numbers = #tpu.dot_dimension_numbers<[1], [0], [0], [1], [0, 0, 1, 1], [], []>} : vector<16x128xbf16>, vector<128x128xbf16>, vector<16x128xf32> -> vector<16x128xf32>
    %c0_13 = arith.constant 0 : index
    %c0_14 = arith.constant 0 : index
    %22 = vector.load %arg5[%c0_13, %c0_14] : memref<1x128xf32, #tpu.memory_space<vmem>>, vector<1x128xf32>
    %23 = vector.broadcast %22 : vector<1x128xf32> to vector<16x128xf32>
    %24 = arith.addf %21, %23 : vector<16x128xf32>
    %cst_15 = arith.constant 0.000000e+00 : f32
    %25 = vector.broadcast %cst_15 : f32 to vector<16x128xf32>
    %26 = arith.minimumf %24, %25 : vector<16x128xf32>
    %27 = math.exp %26 : vector<16x128xf32>
    %cst_16 = arith.constant 1.000000e+00 : f32
    %28 = vector.broadcast %cst_16 : f32 to vector<16x128xf32>
    %29 = arith.subf %27, %28 : vector<16x128xf32>
    %cst_17 = arith.constant 1.67326319 : f32
    %30 = vector.broadcast %cst_17 : f32 to vector<16x128xf32>
    %31 = arith.mulf %30, %29 : vector<16x128xf32>
    %cst_18 = arith.constant 0.000000e+00 : f32
    %32 = vector.broadcast %cst_18 : f32 to vector<16x128xf32>
    %33 = arith.cmpf ogt, %24, %32 : vector<16x128xf32>
    %34 = arith.select %33, %24, %31 : vector<16x128xi1>, vector<16x128xf32>
    %cst_19 = arith.constant 1.05070102 : f32
    %35 = vector.broadcast %cst_19 : f32 to vector<16x128xf32>
    %36 = arith.mulf %35, %34 : vector<16x128xf32>
    %37 = arith.truncf %36 : vector<16x128xf32> to vector<16x128xbf16>
    %c0_20 = arith.constant 0 : index
    %c0_21 = arith.constant 0 : index
    %38 = vector.load %arg6[%c0_20, %c0_21] : memref<128x256xbf16, #tpu.memory_space<vmem>>, vector<128x256xbf16>
    %cst_22 = arith.constant dense<0.000000e+00> : vector<16x256xf32>
    %39 = tpu.matmul %37, %38, %cst_22 {dimension_numbers = #tpu.dot_dimension_numbers<[1], [0], [0], [1], [0, 0, 1, 1], [], []>} : vector<16x128xbf16>, vector<128x256xbf16>, vector<16x256xf32> -> vector<16x256xf32>
    %c0_23 = arith.constant 0 : index
    %c0_24 = arith.constant 0 : index
    %40 = vector.load %arg7[%c0_23, %c0_24] : memref<1x256xf32, #tpu.memory_space<vmem>>, vector<1x256xf32>
    %41 = vector.broadcast %40 : vector<1x256xf32> to vector<16x256xf32>
    %42 = arith.addf %39, %41 : vector<16x256xf32>
    %cst_25 = arith.constant 5.000000e-01 : f32
    %43 = vector.broadcast %cst_25 : f32 to vector<16x256xf32>
    %44 = arith.mulf %43, %42 : vector<16x256xf32>
    %45 = math.tanh %44 : vector<16x256xf32>
    %cst_26 = arith.constant 1.000000e+00 : f32
    %46 = vector.broadcast %cst_26 : f32 to vector<16x256xf32>
    %47 = arith.addf %45, %46 : vector<16x256xf32>
    %cst_27 = arith.constant 5.000000e-01 : f32
    %48 = vector.broadcast %cst_27 : f32 to vector<16x256xf32>
    %49 = arith.mulf %48, %47 : vector<16x256xf32>
    %c0_28 = arith.constant 0 : index
    %c0_29 = arith.constant 0 : index
    %50 = vector.load %arg8[%c0_28, %c0_29] : memref<16x256xf32, #tpu.memory_space<vmem>>, vector<16x256xf32>
    tpu.vector_store %arg8[%c0_28, %c0_29], %49 {strides = array<i32>} : memref<16x256xf32, #tpu.memory_space<vmem>>, vector<16x256xf32>,
    return
  }
  func.func @transform_0(%arg0: i32) -> (i32, i32) {
    %c0_i32 = arith.constant 0 : i32
    %c0_i32_0 = arith.constant 0 : i32
    return %arg0, %c0_i32 : i32, i32
  }
  func.func @transform_1(%arg0: i32) -> (i32, i32) {
    %c0_i32 = arith.constant 0 : i32
    %c0_i32_0 = arith.constant 0 : i32
    %c0_i32_1 = arith.constant 0 : i32
    return %c0_i32, %c0_i32_0 : i32, i32
  }
  func.func @transform_2(%arg0: i32) -> (i32, i32) {
    %c0_i32 = arith.constant 0 : i32
    %c0_i32_0 = arith.constant 0 : i32
    %c0_i32_1 = arith.constant 0 : i32
    return %c0_i32, %c0_i32_0 : i32, i32
  }
  func.func @transform_3(%arg0: i32) -> (i32, i32) {
    %c0_i32 = arith.constant 0 : i32
    %c0_i32_0 = arith.constant 0 : i32
    %c0_i32_1 = arith.constant 0 : i32
    return %c0_i32, %c0_i32_0 : i32, i32
  }
  func.func @transform_4(%arg0: i32) -> (i32, i32) {
    %c0_i32 = arith.constant 0 : i32
    %c0_i32_0 = arith.constant 0 : i32
    %c0_i32_1 = arith.constant 0 : i32
    return %c0_i32, %c0_i32_0 : i32, i32
  }
  func.func @transform_5(%arg0: i32) -> (i32, i32) {
    %c0_i32 = arith.constant 0 : i32
    %c0_i32_0 = arith.constant 0 : i32
    %c0_i32_1 = arith.constant 0 : i32
    return %c0_i32, %c0_i32_0 : i32, i32
  }
  func.func @transform_6(%arg0: i32) -> (i32, i32) {
    %c0_i32 = arith.constant 0 : i32
    %c0_i32_0 = arith.constant 0 : i32
    %c0_i32_1 = arith.constant 0 : i32
    return %c0_i32, %c0_i32_0 : i32, i32
  }
  func.func @transform_7(%arg0: i32) -> (i32, i32) {
    %c0_i32 = arith.constant 0 : i32
    %c0_i32_0 = arith.constant 0 : i32
    return %arg0, %c0_i32 : i32, i32
  }
}

</mosaic_0001>

<bundles_post_ra>
// kernel: tpu_custom_call.1
= control target key start
LH: loop header
LB: loop body
LE: loop exit
PB: predicated region body
PF: predicated region fallthrough
CT: control target
= control target key end

     0   :  { %s1728_s0 = inlined_call_operand.hbm [shape: f32[32,256], index: 0, kind: input, shape index: {}]   ;;  %s1729_s1 = inlined_call_operand.hbm [shape: bf16[256,128], index: 1, kind: input, shape index: {}]   ;;  %s1730_s2 = inlined_call_operand.vmem [shape: f32[1,128], index: 2, kind: input, shape index: {}]   ;;  %s1731_s3 = inlined_call_operand.hbm [shape: bf16[128,128], index: 3, kind: input, shape index: {}]   ;;  %s1732_s4 = inlined_call_operand.hbm [shape: f32[1,128], index: 4, kind: input, shape index: {}]   ;;  %s1733_s5 = inlined_call_operand.hbm [shape: bf16[128,256], index: 5, kind: input, shape index: {}]   ;;  %s1734_s6 = inlined_call_operand.vmem [shape: f32[1,256], index: 6, kind: input, shape index: {}]   ;;  %s1735_s7 = inlined_call_operand.hbm [shape: f32[32,256], index: 7, kind: output, shape index: {}]  }
   0x1   :  { %1736 = sst [smem:[#allocation16_spill]] %s1729_s1 }
   0x2   :  { %12 = vsyncpa [#allocation3], 0 }
   0x3   :  { %14 = vsyncpa [#allocation3 + $0x1], 0 }
   0x4   :  { %15 = vsyncpa [#allocation6], 0 }
   0x5   :  { %16 = vsyncpa [#allocation9], 0 }
   0x6   :  { %17 = vsyncpa [#allocation4], 0 }
   0x7   :  { %19 = vsyncpa [#allocation4 + $0x1], 0  ;;  %s1549_s24 = smov 0   ;;  %s1551_s25 = smov 0  }
   0x8   :  { %s1553_s26 = smov 0   ;;  %s1555_s27 = smov 0  }
   0x9 LB: > { %s1570_s28 = sadd.s32 4294967295, %s1495_s27   ;;  %s926_s29 = sadd.s32 4294967294, %s1495_s27   ;;  %s1495_s27 = sphi %s1555_s27, %s1748_s27   ;;  %s1491_s26 = sphi %s1553_s26, %s1747_s26   ;;  %s1487_s25 = sphi %s1551_s25, %s1746_s25   ;;  %s1483_s24 = sphi %s1549_s24, %s1745_s24  }
   0xa   : > { %p45_p0 = scmp.ne.s32.totalorder %s1487_s25, %s1483_s24  ;;  %p46_p1 = scmp.eq.s32.totalorder %s1570_s28, 0 }
   0xb   : > { %p195_p2 = scmp.eq.s32.totalorder %s1570_s28, 1  ;;  %p201_p3 = scmp.eq.s32.totalorder %s926_s29, 1 }
   0xc   : > { %p1579_p4 = por %p46_p1, %p45_p0  ;;  %p927_p5 = scmp.ge.s32.totalorder %s1495_s27, 1 }
   0xd   : > { %p1584_p6 = por %p201_p3, %p45_p0  ;;  %p208_p7 = scmp.lt.s32.totalorder %s1495_s27, 3 }
   0xe   : > { %s1739_s1 = sld [smem:[#allocation16_spill]]  ;;  %s1497_s13 = smov [#allocation5]  }
   0xf   : > { %p1592_p8 = pnand %p927_p5, %p208_p7  ;;  %s221_s14 = sshll.u32 %s1497_s13, 4  ;;  %s222_s14 = int_to_ptr.vmem [resolvable:$true] %s221_s14 }
  0x10   : > { %s251_s18 = sshll.u32 %s1732_s4, 4  ;;  %s1498_s19 = smov 64   ;;  %s252_s18 = int_to_ptr.hbm [resolvable:$true] %s251_s18 }
  0x11   : > { %p1178_p9 = pneg %p1592_p8  ;;  %s1499_s20 = smov 4  }
  0x12   : > { %s1500_s21 = smov [#allocation8]   ;;  %s236_s9 = sshll.u32 %s1731_s3, 4  ;;  %s237_s9 = int_to_ptr.hbm [resolvable:$true] %s236_s9 }
  0x13   : > { %p1600_p10 = pnand %p1178_p9, %p46_p1  ;;  %s253_s22 = sshll.u32 %s1500_s21, 4  ;;  %s254_s22 = int_to_ptr.vmem [resolvable:$true] %s253_s22 }
  0x14   : > { %s219_s11 = sshll.u32 %s1739_s1, 4  ;;  %s262_s16 = sshll.u32 %s1733_s5, 4  ;;  %s220_s11 = int_to_ptr.hbm [resolvable:$true] %s219_s11  ;;  %s263_s16 = int_to_ptr.hbm [resolvable:$true] %s262_s16 }
  0x15   : > { %1181 = dma.hbm_to_vmem [thread:$0]  (!%p1600_p10), %s220_s11, 2048, %s222_s14, [#allocation6], %s1498_s19, %s1498_s19, %s1499_s20  }
  0x16   : > { %1187 = dma.hbm_to_vmem [thread:$0]  (!%p1600_p10), %s252_s18, 16, %s254_s22, [#allocation9]  }
  0x17   : > { %s1501_s11 = smov [#allocation7]   ;;  %s1502_s17 = smov [#allocation10]  }
  0x18   : > { %s238_s14 = sshll.u32 %s1501_s11, 4  ;;  %s264_s18 = sshll.u32 %s1502_s17, 4  ;;  %s239_s14 = int_to_ptr.vmem [resolvable:$true] %s238_s14  ;;  %s265_s18 = int_to_ptr.vmem [resolvable:$true] %s264_s18 }
  0x19   : > { %1184 = dma.hbm_to_vmem [thread:$0]  (!%p1600_p10), %s237_s9, 1024, %s239_s14, [#allocation6], %s1498_s19, %s1498_s19, %s1499_s20  }
  0x1a   : > { %s1503_s21 = smov 128   ;;  %s1504_s22 = smov 8  }
  0x1b   : > { %1190 = dma.hbm_to_vmem [thread:$0]  (!%p1600_p10), %s263_s16, 2048, %s265_s18, [#allocation9], %s1503_s21, %s1503_s21, %s1504_s22  }
  0x1c   : > { %s1623_s23 = sadd.s32 1, %s1495_s27   ;;  %s32_s10 = sadd.s32 1, %s1491_s26 }
  0x1d   : > { %s29_s29 = ssub.s32 %s1495_s27, %s1623_s23  ;;  %p39_p13 = scmp.ne.s32.totalorder %s1491_s26, %s1487_s25 }
  0x1e   : > { %p30_p12 = scmp.eq.s32.totalorder %s29_s29, 0  ;;  %p40_p0 = scmp.eq.s32.totalorder %s1495_s27, 0 }
  0x1f   : > { %p1636_p5 = por %p195_p2, %p39_p13  ;;  %p1203_p7 = scmp.lt.s32.totalorder %s1495_s27, 2 }
  0x20   : > { %s1632_s13 = scalar_select %p30_p12, %s1491_s26, %s32_s10  }
  0x21   : > { %p41_p3 = por %p40_p0, %p39_p13  ;;  %s281_s20 = sand.u32 1, %s1491_s26  }
  0x22   : > { %s933_s15 = sshll.u32 %s281_s20, 5  ;;  %s1115_s9 = sshll.u32 %s1495_s27, 5 }
  0x23   : > { %s291_s14 = scalar_lea.hbm %s1728_s0, %s1115_s9  ;;  %s285_s17 = scalar_lea.vmem [#allocation2], %s933_s15 }
  0x24   : > { %s294_s18 = sshll.u32 %s285_s17, 4  ;;  %s292_s21 = sshll.u32 %s291_s14, 4  ;;  %s295_s18 = int_to_ptr.vmem [resolvable:$true] %s294_s18  ;;  %s293_s21 = int_to_ptr.hbm [resolvable:$true] %s292_s21 }
  0x25   : > { %p1646_p9 = pnand %p1203_p7, %p41_p3  ;;  %s282_s29 = scalar_lea.sflag [#allocation3], %s281_s20 }
  0x26   : > { %s1391_s10 = sshra.s32 %s293_s21, 4  ;;  %s1398_s16 = scalar_lea.hbm %s1728_s0, 64  ;;  %s1392_s10 = int_to_ptr.hbm [resolvable:$true] %s1391_s10 }
  0x27   : > { %s1393_s1 = scalar_lea.hbm %s1392_s10, 32  ;;  %p1395_p10 = pneg %p1646_p9 }
  0x28   : > { %p1394_p2 = scmp.ne.s32.totalorder %s1392_s10, %s1393_s1  ;;  %p1399_p0 = scmp.lt.s32.totalorder %s1392_s10, %s1728_s0 }
  0x29   : > { %p1400_p3 = scmp.lt.s32.totalorder %s1398_s16, %s1393_s1 }
  0x2a   : > { %p1396_p12 = pnand %p1395_p10, %p1394_p2 }
  0x2b   : > { %p1401_p7 = por %p1400_p3, %p1399_p0 }
  0x2c   : > { %p1397_p13 = pneg %p1396_p12 }
  0x2e   : > { %p1402_p11 = pnand %p1401_p7, %p1397_p13 }
  0x30   : > { %1405 = shalt.err (!%p1402_p11)
}
  0x31   : > { %s1505_s20 = smov 256   ;;  %s1506_s17 = smov 16  }
  0x32   : > { %1194 = dma.hbm_to_vmem [thread:$0]  (!%p1646_p9), %s293_s21, 512, %s295_s18, %s282_s29, %s1505_s20, %s1505_s20, %s1506_s17  }
  0x33   : > { %306 = sbr.rel (%p1592_p8) target bundleno = 572 (0x23c), region = 48  ;;  %s1663_s9 = sand.u32 (!%p1592_p8), 1, %s1487_s25  }
  0x34   : > { %s938_s10 = sshll.u32 (!%p1592_p8), %s1663_s9, 5  ;;  %s309_s1 = scalar_lea.sflag (!%p1592_p8), [#allocation3], %s1663_s9 }
  0x35   : > { %s1669_s15 = scalar_lea.vmem (!%p1592_p8), [#allocation2], %s938_s10 }
  0x38   : > { %1466 = dma.done.wait (%p1579_p4), %s309_s1, 512  }
  0x39   : > { %1468 = vsyncadd (%p1579_p4), %s309_s1, 4294966784 }
  0x3a   : > { %1470 = dma.done.wait (%p46_p1), [#allocation6], 3072  }
  0x3b   : > { %1472 = vsyncadd (%p46_p1), [#allocation6], 4294964224 }
  0x3c   : > { %1474 = dma.done.wait (%p46_p1), [#allocation9], 2064  }
  0x3d   : > { %1476 = vsyncadd (%p46_p1), [#allocation9], 4294965232  ;;  %v1123_v0 = vld [vmem:[#allocation5 + $0x38] sm:$0xff]  ;;  %v1122_v2 = vld [vmem:[#allocation5 + $0x30] sm:$0xff]  ;;  %s363_s22 = scalar_lea.vmem [#allocation11], %s938_s10  ;;  %s1157_s29 = sshll.u32 %s1570_s28, 5 }
  0x3e   : > { %v1131_v1 = vld [vmem:[#allocation5 + $0x78] sm:$0xff]  ;;  %504 = vmatpush.bf16.msra.mxu0 %v1123_v0  ;;  %v1130_v3 = vld [vmem:[#allocation5 + $0x70] sm:$0xff]  ;;  %v1121_v4 = vld [vmem:[#allocation5 + $0x28] sm:$0xff]  ;;  %s811_s14 = scalar_lea.hbm %s1735_s7, %s1157_s29  ;;  %s812_s20 = sshll.u32 %s363_s22, 4  ;;  %s813_s20 = int_to_ptr.vmem [resolvable:$true] %s812_s20 }
  0x3f   : > { %518 = vmatpush.bf16.msra.mxu1 %v1131_v1  ;;  %v1129_v5 = vld [vmem:[#allocation5 + $0x68] sm:$0xff]  ;;  %v1120_v6 = vld [vmem:[#allocation5 + $0x20] sm:$0xff]  ;;  %v1119_v8 = vld [vmem:[#allocation5 + $0x18] sm:$0xff]  ;;  %s814_s17 = sshll.u32 %s811_s14, 4  ;;  %s799_s28 = scalar_lea.sflag [#allocation4], %s1663_s9  ;;  %s815_s17 = int_to_ptr.hbm [resolvable:$true] %s814_s17 }
  0x40   : > { %v1128_v7 = vld [vmem:[#allocation5 + $0x60] sm:$0xff]  ;;  %v1127_v9 = vld [vmem:[#allocation5 + $0x58] sm:$0xff]  ;;  %v1118_v10 = vld [vmem:[#allocation5 + $0x10] sm:$0xff]  ;;  %s1435_s10 = sshra.s32 %s815_s17, 4  ;;  %s1441_s12 = scalar_lea.hbm %s1735_s7, 64  ;;  %s1436_s10 = int_to_ptr.hbm [resolvable:$true] %s1435_s10 }
  0x41   : > { %v1126_v11 = vld [vmem:[#allocation5 + $0x50] sm:$0xff]  ;;  %v1117_v12 = vld [vmem:[#allocation5 + $0x8] sm:$0xff]  ;;  %v1116_v14 = vld [vmem:[#allocation5] sm:$0xff]  ;;  %s1437_s1 = scalar_lea.hbm %s1436_s10, 32  ;;  %p1442_p11 = scmp.lt.s32.totalorder %s1436_s10, %s1735_s7 }
  0x42   : > { %505 = vmatpush.bf16.msra.mxu0 %v1122_v2  ;;  %v1125_v13 = vld [vmem:[#allocation5 + $0x48] sm:$0xff]  ;;  %v1124_v15 = vld [vmem:[#allocation5 + $0x40] sm:$0xff]  ;;  %v368_v17 = vld [vmem:[%s1669_s15 + $0x10] sm:$0xff]  ;;  %p1438_p1 = scmp.ne.s32.totalorder %s1436_s10, %s1437_s1  ;;  %p1443_p9 = scmp.lt.s32.totalorder %s1441_s12, %s1437_s1 }
  0x43   : > { %519 = vmatpush.bf16.msra.mxu1 %v1130_v3  ;;  %v366_v16 = vld [vmem:[%s1669_s15] sm:$0xff]  ;;  %v367_v18 = vld [vmem:[%s1669_s15 + $0x8] sm:$0xff]  ;;  %v369_v19 = vld [vmem:[%s1669_s15 + $0x18] sm:$0xff] }
  0x44   : > { %v370_v20 = vpack.c.bf16 %v368_v17, %v366_v16  ;;  %v371_v21 = vpack.c.bf16 %v369_v19, %v367_v18  ;;  %v1139_v22 = vld [vmem:[#allocation7 + $0x38] sm:$0xff]  ;;  %v1138_v23 = vld [vmem:[#allocation7 + $0x30] sm:$0xff]  ;;  %v1137_v24 = vld [vmem:[#allocation7 + $0x28] sm:$0xff]  ;;  %p1439_p4 = pnand %p1438_p1, %p1636_p5  ;;  %p1444_p2 = por %p1443_p9, %p1442_p11 }
  0x45   : > { %617 = vmatpush.bf16.msra.mxu2 %v1139_v22  ;;  %v1136_v25 = vld [vmem:[#allocation7 + $0x20] sm:$0xff]  ;;  %v1135_v26 = vld [vmem:[#allocation7 + $0x18] sm:$0xff]  ;;  %v1134_v27 = vld [vmem:[#allocation7 + $0x10] sm:$0xff] }
  0x46   : > { %506 = vmatpush.bf16.msra.mxu0 %v1121_v4  ;;  %v1133_v28 = vld [vmem:[#allocation7 + $0x8] sm:$0xff]  ;;  %v1132_v29 = vld [vmem:[#allocation7] sm:$0xff]  ;;  %v1102_v54 = vld [vmem:[#allocation10 + $0x70] sm:$0xf]  ;;  %p1440_p8 = pneg %p1439_p4 }
  0x47   : > { %520 = vmatpush.bf16.msra.mxu1 %v1129_v5  ;;  %v1253_v30 = vld [vmem:[%s1730_s2] ss:$0 sm:$0xff]  ;;  %v1155_v55 = vld [vmem:[#allocation10 + $0x74] sm:$0xf0]  ;;  %v1154_v56 = vld [vmem:[#allocation10 + $0x74] sm:$0xf] }
  0x48   : > { %v1103_v57 = vor.u32 %v1155_v55, %v1102_v54  ;;  %v1104_v58 = vld [vmem:[#allocation10 + $0x78] sm:$0xf0]  ;;  %v1094_v60 = vld [vmem:[#allocation10 + $0x60] sm:$0xf]  ;;  %v1153_v61 = vld [vmem:[#allocation10 + $0x64] sm:$0xf0]  ;;  %p1445_p10 = pnand %p1444_p2, %p1440_p8 }
  0x49   : > { %618 = vmatpush.bf16.msra.mxu2 %v1138_v23  ;;  %v1107_v59 = vor.u32 %v1154_v56, %v1104_v58  ;;  %v1152_v62 = vld [vmem:[#allocation10 + $0x64] sm:$0xf]  ;;  %v1095_v63 = vor.u32 %v1153_v61, %v1094_v60  ;;  %v1096_v0 = vld [vmem:[#allocation10 + $0x68] sm:$0xf0]  ;;  %v1086_v2 = vld [vmem:[#allocation10 + $0x50] sm:$0xf] }
  0x4a   : > { %507 = vmatpush.bf16.msra.mxu0 %v1120_v6  ;;  %750 = vmatpush.bf16.msra.mxu3 %v1103_v57  ;;  %v1099_v1 = vor.u32 %v1152_v62, %v1096_v0  ;;  %v1151_v3 = vld [vmem:[#allocation10 + $0x54] sm:$0xf0]  ;;  %v1150_v4 = vld [vmem:[#allocation10 + $0x54] sm:$0xf]  ;;  %v1088_v6 = vld [vmem:[#allocation10 + $0x58] sm:$0xf0] }
  0x4b   : > { %521 = vmatpush.bf16.msra.mxu1 %v1128_v7  ;;  %v1087_v5 = vor.u32 %v1151_v3, %v1086_v2  ;;  %v1091_v7 = vor.u32 %v1150_v4, %v1088_v6  ;;  %v1146_v16 = vld [vmem:[#allocation10 + $0x34] sm:$0xf]  ;;  %v1072_v18 = vld [vmem:[#allocation10 + $0x38] sm:$0xf0]  ;;  %v1144_v22 = vld [vmem:[#allocation10 + $0x24] sm:$0xf] }
  0x4c   : > { %v1075_v19 = vor.u32 %v1146_v16, %v1072_v18  ;;  %v664_v58 = vld [vmem:[%s1734_s6] sm:$0x3] }
  0x4d   : > { %619 = vmatpush.bf16.msra.mxu2 %v1137_v24  ;;  %v1064_v24 = vld [vmem:[#allocation10 + $0x28] sm:$0xf0] }
  0x4e   : > { %508 = vmatpush.bf16.msra.mxu0 %v1119_v8  ;;  %751 = vmatpush.bf16.msra.mxu3 %v1095_v63  ;;  %v1078_v8 = vld [vmem:[#allocation10 + $0x40] sm:$0xf]  ;;  %v666_v63 = vperm.slane %v664_v58, 0 }
  0x4f   : > { %522 = vmatpush.bf16.msra.mxu1 %v1127_v9  ;;  %v1149_v9 = vld [vmem:[#allocation10 + $0x44] sm:$0xf0] }
  0x51   : > { %620 = vmatpush.bf16.msra.mxu2 %v1136_v25  ;;  %v1067_v25 = vor.u32 %v1144_v22, %v1064_v24 }
  0x52   : > { %509 = vmatpush.bf16.msra.mxu0 %v1118_v10  ;;  %752 = vmatpush.bf16.msra.mxu3 %v1087_v5  ;;  %v1148_v10 = vld [vmem:[#allocation10 + $0x44] sm:$0xf] }
  0x53   : > { %523 = vmatpush.bf16.msra.mxu1 %v1126_v11  ;;  %v1079_v11 = vor.u32 %v1149_v9, %v1078_v8 }
  0x55   : > { %621 = vmatpush.bf16.msra.mxu2 %v1135_v26  ;;  %v1054_v26 = vld [vmem:[#allocation10 + $0x10] sm:$0xf] }
  0x56   : > { %510 = vmatpush.bf16.msra.mxu0 %v1117_v12  ;;  %v1080_v12 = vld [vmem:[#allocation10 + $0x48] sm:$0xf0]  ;;  %753 = vmatpush.bf16.msra.mxu3 %v1079_v11 }
  0x57   : > { %524 = vmatpush.bf16.msra.mxu1 %v1125_v13  ;;  %v1083_v13 = vor.u32 %v1148_v10, %v1080_v12 }
  0x59   : > { %622 = vmatpush.bf16.msra.mxu2 %v1134_v27  ;;  %v1143_v27 = vld [vmem:[#allocation10 + $0x14] sm:$0xf0] }
  0x5a   : > { %511 = vmatpush.bf16.msra.mxu0 %v1116_v14  ;;  %v1070_v14 = vld [vmem:[#allocation10 + $0x30] sm:$0xf] }
  0x5b   : > { %525 = vmatpush.bf16.msra.mxu1 %v1124_v15  ;;  %v1147_v15 = vld [vmem:[#allocation10 + $0x34] sm:$0xf0] }
  0x5c   : > { %v1071_v17 = vor.u32 %v1147_v15, %v1070_v14 }
  0x5d   : > { %512 = vmatmul.bf16.vlgmr.msra.gmra.mxu0 %v370_v20  ;;  %623 = vmatpush.bf16.msra.mxu2 %v1133_v28  ;;  %v1062_v20 = vld [vmem:[#allocation10 + $0x20] sm:$0xf]  ;;  %v1142_v28 = vld [vmem:[#allocation10 + $0x14] sm:$0xf] }
  0x5e   : > { %526 = vmatmul.bf16.vlgmr.msra.gmra.mxu1 %v371_v21  ;;  %764 = vmatpush.bf16.msrb.mxu0 %v1107_v59  ;;  %v1145_v21 = vld [vmem:[#allocation10 + $0x24] sm:$0xf0]  ;;  %v667_v59 = vperm.slane %v664_v58, 1 }
  0x5f   : > { %754 = vmatpush.bf16.msra.mxu3 %v1071_v17  ;;  %v1063_v23 = vor.u32 %v1145_v21, %v1062_v20 }
  0x61   : > { %624 = vmatpush.bf16.msra.mxu2 %v1132_v29  ;;  %v1055_v29 = vor.u32 %v1143_v27, %v1054_v26 }
  0x62   : > { %765 = vmatpush.bf16.msrb.mxu0 %v1099_v1 }
  0x63   : > { %755 = vmatpush.bf16.msra.mxu3 %v1063_v23 }
  0x66   : > { %766 = vmatpush.bf16.msrb.mxu0 %v1091_v7 }
  0x67   : > { %756 = vmatpush.bf16.msra.mxu3 %v1055_v29 }
  0x6a   : > { %767 = vmatpush.bf16.msrb.mxu0 %v1083_v13 }
  0x6e   : > { %768 = vmatpush.bf16.msrb.mxu0 %v1075_v19 }
  0x72   : > { %769 = vmatpush.bf16.msrb.mxu0 %v1067_v25 }
  0xda   : > { %v513_v31 = vpop.f32.mrf.mxu0 }
  0xdb   : > { %v527_v32 = vpop.f32.mrf.mxu1  ;;  %v514_v33 = vadd.f32 %v1253_v30, %v513_v31  ;;  %v1046_v31 = vld [vmem:[#allocation10] sm:$0xf] }
  0xdd   : > { %v528_v34 = vadd.f32 %v527_v32, %v514_v33  ;;  %v1141_v32 = vld [vmem:[#allocation10 + $0x4] sm:$0xf0] }
  0xdf   : > { %v532_v35 = vmin.f32 %v528_v34, 0.0  ;;  %vm542_vm0 = vcmp.gt.f32.partialorder %v528_v34, 0.0 }
  0xe1   : > { %v534_v36 = vmul.f32 1.442695, %v532_v35  ;;  %v1048_v35 = vld [vmem:[#allocation10 + $0x8] sm:$0xf0] }
  0xe2   : > { %v515_v37 = vpop.f32.mrf.mxu0 }
  0xe3   : > { %1255 = vpow2.f32 %v534_v36  ;;  %v516_v38 = vadd.f32 %v1253_v30, %v515_v37  ;;  %v529_v39 = vpop.f32.mrf.mxu1  ;;  %v1056_v30 = vld [vmem:[#allocation10 + $0x18] sm:$0xf0]  ;;  %v1047_v36 = vor.u32 %v1141_v32, %v1046_v31 }
  0xe4   : > { %v1059_v33 = vor.u32 %v1142_v28, %v1056_v30 }
  0xe5   : > { %v530_v40 = vadd.f32 %v529_v39, %v516_v38  ;;  %757 = vmatpush.bf16.msra.mxu3 %v1047_v36  ;;  %v1254_v38 = vld [vmem:[#allocation8] ss:$0 sm:$0xff] }
  0xe6   : > { %770 = vmatpush.bf16.msrb.mxu0 %v1059_v33 }
  0xe7   : > { %v533_v41 = vmin.f32 %v530_v40, 0.0  ;;  %vm543_vm1 = vcmp.gt.f32.partialorder %v530_v40, 0.0 }
  0xe9   : > { %v1256_v42 = vpop.eup %1255  ;;  %v536_v43 = vmul.f32 1.442695, %v533_v41 }
  0xea   : > { %v1008_v44 = vadd.f32 -1.0, %v1256_v42 }
  0xeb   : > { %1257 = vpow2.f32 %v536_v43 }
  0xec   : > { %v540_v45 = vmul.f32 1.6732632, %v1008_v44 }
  0xee   : > { %v544_v49 = vsel %vm542_vm0, %v528_v34, %v540_v45  ;;  %v1140_v34 = vld [vmem:[#allocation10 + $0x4] sm:$0xf] }
  0xef   : > { %v546_v51 = vmul.f32 1.050701, %v544_v49  ;;  %v1051_v37 = vor.u32 %v1140_v34, %v1048_v35 }
  0xf1   : > { %v1258_v46 = vpop.eup %1257  ;;  %771 = vmatpush.bf16.msrb.mxu0 %v1051_v37 }
  0xf2   : > { %v1009_v47 = vadd.f32 -1.0, %v1258_v46 }
  0xf4   : > { %v541_v48 = vmul.f32 1.6732632, %v1009_v47 }
  0xf6   : > { %v545_v50 = vsel %vm543_vm1, %v530_v40, %v541_v48 }
  0xf7   : > { %v547_v52 = vmul.f32 1.050701, %v545_v50 }
  0xf9   : > { %v548_v53 = vpack.c.bf16 %v547_v52, %v546_v51 }
  0xfb   : > { %625 = vmatmul.bf16.vlgmr.msra.gmra.mxu2 %v548_v53 }
 0x17e   : > { %v626_v39 = vpop.f32.mrf.mxu2 }
 0x17f   : > { %v627_v40 = vadd.f32 %v1254_v38, %v626_v39 }
 0x181   : > { %v631_v41 = vmin.f32 %v627_v40, 0.0  ;;  %vm641_vm2 = vcmp.gt.f32.partialorder %v627_v40, 0.0 }
 0x183   : > { %v633_v42 = vmul.f32 1.442695, %v631_v41 }
 0x185   : > { %1259 = vpow2.f32 %v633_v42 }
 0x186   : > { %v628_v43 = vpop.f32.mrf.mxu2 }
 0x187   : > { %v629_v44 = vadd.f32 %v1254_v38, %v628_v43 }
 0x189   : > { %v632_v45 = vmin.f32 %v629_v44, 0.0  ;;  %vm642_vm3 = vcmp.gt.f32.partialorder %v629_v44, 0.0 }
 0x18b   : > { %v1260_v46 = vpop.eup %1259  ;;  %v635_v47 = vmul.f32 1.442695, %v632_v45 }
 0x18c   : > { %v1042_v48 = vadd.f32 -1.0, %v1260_v46 }
 0x18d   : > { %1261 = vpow2.f32 %v635_v47 }
 0x18e   : > { %v639_v49 = vmul.f32 1.6732632, %v1042_v48 }
 0x190   : > { %v643_v53 = vsel %vm641_vm2, %v627_v40, %v639_v49 }
 0x191   : > { %v645_v55 = vmul.f32 1.050701, %v643_v53 }
 0x193   : > { %v1262_v50 = vpop.eup %1261 }
 0x194   : > { %v1043_v51 = vadd.f32 -1.0, %v1262_v50 }
 0x196   : > { %v640_v52 = vmul.f32 1.6732632, %v1043_v51 }
 0x198   : > { %v644_v54 = vsel %vm642_vm3, %v629_v44, %v640_v52 }
 0x199   : > { %v646_v56 = vmul.f32 1.050701, %v644_v54 }
 0x19b   : > { %v647_v57 = vpack.c.bf16 %v646_v56, %v645_v55 }
 0x19d   : > { %758 = vmatmul.bf16.vlgmr.msra.gmra.mxu3 %v647_v57  ;;  %772 = vmatmul.bf16.vlgmr.msrb.gmra.mxu0 %v647_v57 }
 0x21a   : > { %v773_v60 = vpop.f32.mrf.mxu0 }
 0x21b   : > { %v774_v61 = vadd.f32 %v773_v60, %v667_v59 }
 0x21d   : > { %v779_v62 = vmul.f32 0.5, %v774_v61 }
 0x21f   : > { %1263 = vtanh.f32 %v779_v62 }
 0x220   : > { %v759_v0 = vpop.f32.mrf.mxu3 }
 0x221   : > { %v760_v1 = vadd.f32 %v759_v0, %v666_v63 }
 0x222   : > { %v775_v2 = vpop.f32.mrf.mxu0 }
 0x223   : > { %v778_v3 = vmul.f32 0.5, %v760_v1  ;;  %v776_v4 = vadd.f32 %v775_v2, %v667_v59 }
 0x225   : > { %v1264_v5 = vpop.eup %1263  ;;  %1265 = vtanh.f32 %v778_v3  ;;  %v781_v6 = vmul.f32 0.5, %v776_v4 }
 0x226   : > { %v787_v7 = vadd.f32 1.0, %v1264_v5 }
 0x227   : > { %1267 = vtanh.f32 %v781_v6 }
 0x228   : > { %v791_v8 = vmul.f32 0.5, %v787_v7  ;;  %v761_v9 = vpop.f32.mrf.mxu3 }
 0x229   : > { %v762_v10 = vadd.f32 %v761_v9, %v666_v63 }
 0x22a   : > { %795 = vst [vmem:[%s363_s22 + $0x8] sm:$0xff] %v791_v8 }
 0x22b   : > { %v1266_v11 = vpop.eup %1265  ;;  %v780_v12 = vmul.f32 0.5, %v762_v10 }
 0x22c   : > { %v786_v13 = vadd.f32 1.0, %v1266_v11 }
 0x22d   : > { %v1268_v14 = vpop.eup %1267  ;;  %1269 = vtanh.f32 %v780_v12 }
 0x22e   : > { %v790_v15 = vmul.f32 0.5, %v786_v13  ;;  %v789_v16 = vadd.f32 1.0, %v1268_v14 }
 0x230   : > { %794 = vst [vmem:[%s363_s22] sm:$0xff] %v790_v15  ;;  %v793_v17 = vmul.f32 0.5, %v789_v16 }
 0x232   : > { %797 = vst [vmem:[%s363_s22 + $0x18] sm:$0xff] %v793_v17 }
 0x233   : > { %v1270_v18 = vpop.eup %1269 }
 0x234   : > { %v788_v19 = vadd.f32 1.0, %v1270_v18 }
 0x236   : > { %v792_v20 = vmul.f32 0.5, %v788_v19 }
 0x238   : > { %796 = vst [vmem:[%s363_s22 + $0x10] sm:$0xff] %v792_v20 }
 0x239   : > { %1448 = shalt.err (!%p1445_p10)
}
 0x23a   : > { %s1507_s9 = smov 256   ;;  %s1508_s22 = smov 16  }
 0x23b   : > { %1176 = dma.vmem_to_hbm [thread:$0]  (%p1636_p5), %s813_s20, 512, %s815_s17, %s799_s28, %s1507_s9, %s1507_s9, %s1508_s22  }
 0x23c PF: > { %s829_s29 = sand.u32 1, %s1483_s24   ;;  %p1744_p12 = scmp.ge.s32.totalorder %s1495_s27, 2 }
 0x23d   : > { %s830_s16 = scalar_lea.sflag [#allocation4], %s829_s29 }
 0x23e   : > { %p1196_p13 = pnand %p1744_p12, %p1584_p6 }
 0x240   : > { %p1197_p0 = pneg %p1196_p13 }
 0x242   : > { %1478 = dma.done.wait (%p1197_p0), %s830_s16, 512  }
 0x243   : > { %1480 = vsyncadd (%p1197_p0), %s830_s16, 4294966784  ;;  %p22_p3 = scmp.ge.s32.totalorder %s1623_s23, 4   ;;  %s1745_s24 = smov %s1487_s25 }
 0x244   : > { %s1746_s25 = smov %s1491_s26  ;;  %s1747_s26 = smov %s1632_s13 }
 0x245   : > { %s1748_s27 = smov %s1623_s23  ;;  %24 = sbr.rel (!%p22_p3) target bundleno = 9 (0x9), region = 109 }
 0x24a   :  { %836 = vsyncpa [#allocation3], 1 }
 0x24b   :  { %838 = vsyncpa [#allocation3 + $0x1], 1 }
 0x24c   :  { %839 = vsyncpa [#allocation6], 1 }
 0x24d   :  { %840 = vsyncpa [#allocation9], 1 }
 0x24e   :  { %841 = vsyncpa [#allocation4], 1 }
 0x24f   :  { %843 = vsyncpa [#allocation4 + $0x1], 1 }

</bundles_post_ra>
